<compile_context>
chip_gen: v7x
topology: tpu7x:2x2x1
jax: 0.10.0
libtpu: 0.0.40
codegen_flags: <defaults>
</compile_context>

<pallas_src>
import functools

import jax
import jax.numpy as jnp
from jax.experimental import pallas as pl
from jax.experimental.pallas import tpu as pltpu

D_IN = 784      # 1 * 28 * 28
D_HID = 256
D_OUT = 10
N_PAD = 128     # lane-dense padded output width (>= D_OUT, multiple of 128)


def _round_up(x, m):
    return (x + m - 1) // m * m


def mlp_kernel(x_ref, w1_ref, b1_ref, w2_ref, b2_ref, o_ref):
    # x_ref : (TB, 784) f32      w1_ref: (784, 256) bf16   b1_ref: (1, 256) f32
    # w2_ref: (256, 128) bf16    b2_ref: (1, 128)  f32     o_ref : (TB, 128) bf16
    # Cast x to bf16 in VMEM (kernel reads f32 once from HBM; no wrapper cast pass).
    x = x_ref[...].astype(jnp.bfloat16)
    # fc1 (MXU, bf16 inputs, f32 accumulate) + bias + ReLU in f32
    h = jnp.dot(x, w1_ref[...], preferred_element_type=jnp.float32)
    h = jnp.maximum(h + b1_ref[...], 0.0)
    # fc2 (cast activations back to bf16 for the MXU, accumulate f32)
    out = jnp.dot(h.astype(jnp.bfloat16), w2_ref[...],
                  preferred_element_type=jnp.float32)
    # bf16 writeback halves output HBM traffic (logits keep ~3 sig digits).
    o_ref[...] = (out + b2_ref[...]).astype(jnp.bfloat16)


def prepare_params(w1, b1, w2, b2):
    """One-time packing: transpose, bf16-cast, lane-pad fc2 to N_PAD columns."""
    w1t = jnp.asarray(w1, jnp.float32).T.astype(jnp.bfloat16)          # (784, 256)
    b1r = jnp.asarray(b1, jnp.float32).reshape(1, D_HID)               # (1, 256)
    w2t = jnp.zeros((D_HID, N_PAD), jnp.bfloat16)
    w2t = w2t.at[:, :D_OUT].set(jnp.asarray(w2, jnp.float32).T.astype(jnp.bfloat16))
    b2r = jnp.zeros((1, N_PAD), jnp.float32)
    b2r = b2r.at[:, :D_OUT].set(jnp.asarray(b2, jnp.float32))
    return w1t, b1r, w2t, b2r


@functools.partial(jax.jit, static_argnames=("max_batch_tile",))
def my_model_forward(x_nchw, w1t, b1r, w2t, b2r, *, max_batch_tile=512):
    """x_nchw: (B, C, H, W) with C*H*W == 784. Returns (B, 10) f32 logits."""
    B = x_nchw.shape[0]
    # torch.flatten(x, 1): contiguous reshape, free. Stays f32 (cast is in-kernel).
    x2d = x_nchw.reshape(B, D_IN)

    # Batch tile: big (512) for large batches; otherwise split into >=2 grid steps
    # (megacore sharding + double-buffer overlap) with the 8-row sublane multiple.
    if B >= 2 * max_batch_tile:
        TB = max_batch_tile
    else:
        TB = max(_round_up(pl.cdiv(B, 2), 8), 8)
    grid = (pl.cdiv(B, TB),)   # ragged last block handled by Pallas (no jnp.pad)

    cost = pl.CostEstimate(
        flops=2 * B * D_IN * D_HID + 2 * B * D_HID * N_PAD,
        transcendentals=0,
        bytes_accessed=(B * D_IN * 4             # x (f32, read once)
                        + D_IN * D_HID * 2       # w1 (bf16)
                        + D_HID * 4              # b1 (f32)
                        + D_HID * N_PAD * 2      # w2 (bf16, padded)
                        + N_PAD * 4              # b2 (f32, padded)
                        + B * N_PAD * 2),        # out (bf16, padded)
    )

    out_pad = pl.pallas_call(
        mlp_kernel,
        out_shape=jax.ShapeDtypeStruct((B, N_PAD), jnp.bfloat16),
        grid=grid,
        in_specs=[
            pl.BlockSpec((TB, D_IN), lambda i: (i, 0)),        # x: tiled over batch
            pl.BlockSpec((D_IN, D_HID), lambda i: (0, 0)),     # w1: resident
            pl.BlockSpec((1, D_HID), lambda i: (0, 0)),        # b1: resident
            pl.BlockSpec((D_HID, N_PAD), lambda i: (0, 0)),    # w2: resident
            pl.BlockSpec((1, N_PAD), lambda i: (0, 0)),        # b2: resident
        ],
        out_specs=pl.BlockSpec((TB, N_PAD), lambda i: (i, 0)),
        compiler_params=pltpu.CompilerParams(
            dimension_semantics=("parallel",),
        ),
        cost_estimate=cost,
    )(x2d, w1t, b1r, w2t, b2r)

    return out_pad[:, :D_OUT].astype(jnp.float32)


def init_params(key):
    """Deterministic init mirroring nn.Linear defaults (U[-1/sqrt(fan_in), +])."""
    k1, k2, k3, k4 = jax.random.split(key, 4)
    bound1 = 1.0 / jnp.sqrt(float(D_IN))
    bound2 = 1.0 / jnp.sqrt(float(D_HID))
    w1 = jax.random.uniform(k1, (D_HID, D_IN), jnp.float32, -bound1, bound1)
    b1 = jax.random.uniform(k2, (D_HID,), jnp.float32, -bound1, bound1)
    w2 = jax.random.uniform(k3, (D_OUT, D_HID), jnp.float32, -bound2, bound2)
    b2 = jax.random.uniform(k4, (D_OUT,), jnp.float32, -bound2, bound2)
    return w1, b1, w2, b2


def _reference(x, w1, b1, w2, b2):
    """Pure-JAX reference with the same bf16-input / f32-accumulate math."""
    B = x.shape[0]
    x_bf = x.reshape(B, D_IN).astype(jnp.bfloat16)
    h = jnp.maximum(
        jnp.dot(x_bf, w1.T.astype(jnp.bfloat16),
                preferred_element_type=jnp.float32) + b1, 0.0)
    return jnp.dot(h.astype(jnp.bfloat16), w2.T.astype(jnp.bfloat16),
                   preferred_element_type=jnp.float32) + b2


if __name__ == "__main__":
    key = jax.random.PRNGKey(0)
    k_param, k_x1, k_x2 = jax.random.split(key, 3)
    w1, b1, w2, b2 = init_params(k_param)

    # Pack weights ONCE (transpose + bf16 + lane padding) — not per forward.
    w1t, b1r, w2t, b2r = prepare_params(w1, b1, w2, b2)

    # Small MNIST-like batch: (B=8, C=1, H=28, W=28) -> flattened dim 784.
    B = 8
    x = jax.random.normal(k_x1, (B, 1, 28, 28), jnp.float32)

    out = my_model_forward(x, w1t, b1r, w2t, b2r)
    out = jax.block_until_ready(out)
    assert out.shape == (B, D_OUT)

    # bf16-math reference (output is bf16-rounded in the kernel -> loose tolerance).
    ref = _reference(x, w1, b1, w2, b2)
    assert jnp.allclose(out, ref, atol=3e-2, rtol=3e-2)

    # Full-f32 reference sanity check (even looser, bf16 matmul inputs + bf16 store).
    ref_f32 = jnp.maximum(x.reshape(B, D_IN) @ w1.T + b1, 0.0) @ w2.T + b2
    assert jnp.allclose(out, ref_f32, atol=6e-2, rtol=6e-2)

    # Exercise the ragged-grid / multi-step path (B=20 -> TB=16, grid=(2,),
    # last block partially out-of-bounds and masked on store).
    B2 = 20
    x2 = jax.random.normal(k_x2, (B2, 1, 28, 28), jnp.float32)
    out2 = jax.block_until_ready(my_model_forward(x2, w1t, b1r, w2t, b2r))
    assert out2.shape == (B2, D_OUT)
    ref2 = _reference(x2, w1, b1, w2, b2)
    assert jnp.allclose(out2, ref2, atol=3e-2, rtol=3e-2)
    assert bool(jnp.all(jnp.isfinite(out2)))

    print("KERNEL_OK")
</pallas_src>

<mosaic_0001>
module attributes {stable_mosaic.version = 11 : i64} {
  func.func @mlp_kernel(%arg0: i32, %arg1: memref<8x784xf32, #tpu.memory_space<vmem>>, %arg2: memref<784x256xbf16, #tpu.memory_space<vmem>>, %arg3: memref<1x256xf32, #tpu.memory_space<vmem>>, %arg4: memref<256x128xbf16, #tpu.memory_space<vmem>>, %arg5: memref<1x128xf32, #tpu.memory_space<vmem>>, %arg6: memref<8x128xbf16, #tpu.memory_space<vmem>>) attributes {dimension_semantics = [#tpu.dimension_semantics<parallel>], iteration_bounds = array<i64: 1>, scalar_prefetch = 0 : i64, scratch_operands = 0 : i64, tpu.core_type = #tpu.core_type<tc>, window_params = [{transform_indices = @transform_0, window_bounds = array<i64: 8, 784>}, {pipeline_mode = #tpu.pipeline_mode<synchronous>, transform_indices = @transform_1, window_bounds = array<i64: 784, 256>}, {pipeline_mode = #tpu.pipeline_mode<synchronous>, transform_indices = @transform_2, window_bounds = array<i64: 1, 256>}, {pipeline_mode = #tpu.pipeline_mode<synchronous>, transform_indices = @transform_3, window_bounds = array<i64: 256, 128>}, {pipeline_mode = #tpu.pipeline_mode<synchronous>, transform_indices = @transform_4, window_bounds = array<i64: 1, 128>}, {transform_indices = @transform_5, window_bounds = array<i64: 8, 128>}]} {
    %c0 = arith.constant 0 : index
    %c0_0 = arith.constant 0 : index
    %0 = vector.load %arg1[%c0, %c0_0] : memref<8x784xf32, #tpu.memory_space<vmem>>, vector<8x784xf32>
    %1 = arith.truncf %0 : vector<8x784xf32> to vector<8x784xbf16>
    %c0_1 = arith.constant 0 : index
    %c0_2 = arith.constant 0 : index
    %2 = vector.load %arg2[%c0_1, %c0_2] : memref<784x256xbf16, #tpu.memory_space<vmem>>, vector<784x256xbf16>
    %cst = arith.constant dense<0.000000e+00> : vector<8x256xf32>
    %3 = tpu.matmul %1, %2, %cst {dimension_numbers = #tpu.dot_dimension_numbers<[1], [0], [0], [1], [0, 0, 1, 1], [], []>} : vector<8x784xbf16>, vector<784x256xbf16>, vector<8x256xf32> -> vector<8x256xf32>
    %c0_3 = arith.constant 0 : index
    %c0_4 = arith.constant 0 : index
    %4 = vector.load %arg3[%c0_3, %c0_4] : memref<1x256xf32, #tpu.memory_space<vmem>>, vector<1x256xf32>
    %5 = vector.broadcast %4 : vector<1x256xf32> to vector<8x256xf32>
    %6 = arith.addf %3, %5 : vector<8x256xf32>
    %cst_5 = arith.constant 0.000000e+00 : f32
    %7 = vector.broadcast %cst_5 : f32 to vector<8x256xf32>
    %8 = arith.maximumf %6, %7 : vector<8x256xf32>
    %9 = arith.truncf %8 : vector<8x256xf32> to vector<8x256xbf16>
    %c0_6 = arith.constant 0 : index
    %c0_7 = arith.constant 0 : index
    %10 = vector.load %arg4[%c0_6, %c0_7] : memref<256x128xbf16, #tpu.memory_space<vmem>>, vector<256x128xbf16>
    %cst_8 = arith.constant dense<0.000000e+00> : vector<8x128xf32>
    %11 = tpu.matmul %9, %10, %cst_8 {dimension_numbers = #tpu.dot_dimension_numbers<[1], [0], [0], [1], [0, 0, 1, 1], [], []>} : vector<8x256xbf16>, vector<256x128xbf16>, vector<8x128xf32> -> vector<8x128xf32>
    %c0_9 = arith.constant 0 : index
    %c0_10 = arith.constant 0 : index
    %12 = vector.load %arg5[%c0_9, %c0_10] : memref<1x128xf32, #tpu.memory_space<vmem>>, vector<1x128xf32>
    %13 = vector.broadcast %12 : vector<1x128xf32> to vector<8x128xf32>
    %14 = arith.addf %11, %13 : vector<8x128xf32>
    %15 = arith.truncf %14 : vector<8x128xf32> to vector<8x128xbf16>
    %c0_11 = arith.constant 0 : index
    %c0_12 = arith.constant 0 : index
    %16 = vector.load %arg6[%c0_11, %c0_12] : memref<8x128xbf16, #tpu.memory_space<vmem>>, vector<8x128xbf16>
    tpu.vector_store %arg6[%c0_11, %c0_12], %15 {strides = array<i32>} : memref<8x128xbf16, #tpu.memory_space<vmem>>, vector<8x128xbf16>,
    return
  }
  func.func @transform_0(%arg0: i32) -> (i32, i32) {
    %c0_i32 = arith.constant 0 : i32
    %c0_i32_0 = arith.constant 0 : i32
    return %arg0, %c0_i32 : i32, i32
  }
  func.func @transform_1(%arg0: i32) -> (i32, i32) {
    %c0_i32 = arith.constant 0 : i32
    %c0_i32_0 = arith.constant 0 : i32
    %c0_i32_1 = arith.constant 0 : i32
    return %c0_i32, %c0_i32_0 : i32, i32
  }
  func.func @transform_2(%arg0: i32) -> (i32, i32) {
    %c0_i32 = arith.constant 0 : i32
    %c0_i32_0 = arith.constant 0 : i32
    %c0_i32_1 = arith.constant 0 : i32
    return %c0_i32, %c0_i32_0 : i32, i32
  }
  func.func @transform_3(%arg0: i32) -> (i32, i32) {
    %c0_i32 = arith.constant 0 : i32
    %c0_i32_0 = arith.constant 0 : i32
    %c0_i32_1 = arith.constant 0 : i32
    return %c0_i32, %c0_i32_0 : i32, i32
  }
  func.func @transform_4(%arg0: i32) -> (i32, i32) {
    %c0_i32 = arith.constant 0 : i32
    %c0_i32_0 = arith.constant 0 : i32
    %c0_i32_1 = arith.constant 0 : i32
    return %c0_i32, %c0_i32_0 : i32, i32
  }
  func.func @transform_5(%arg0: i32) -> (i32, i32) {
    %c0_i32 = arith.constant 0 : i32
    %c0_i32_0 = arith.constant 0 : i32
    return %arg0, %c0_i32 : i32, i32
  }
}

</mosaic_0001>

<bundles_post_ra>
// kernel: my_model_forward.1
= control target key start
LH: loop header
LB: loop body
LE: loop exit
PB: predicated region body
PF: predicated region fallthrough
CT: control target
= control target key end

     0   :  { %10 = vsyncpa [#allocation3], 0  ;;  %s1342_s18 = smov [#allocation2]   ;;  %s1712_s0 = inlined_call_operand.vmem [shape: f32[8,784], index: 0, kind: input, shape index: {}]   ;;  %s1713_s1 = inlined_call_operand.vmem [shape: bf16[784,256], index: 1, kind: input, shape index: {}]   ;;  %s1714_s2 = inlined_call_operand.vmem [shape: f32[1,256], index: 2, kind: input, shape index: {}]   ;;  %s1715_s3 = inlined_call_operand.hbm [shape: bf16[256,128], index: 3, kind: input, shape index: {}]   ;;  %s1716_s4 = inlined_call_operand.vmem [shape: f32[1,128], index: 4, kind: input, shape index: {}]   ;;  %s1717_s5 = inlined_call_operand.vmem [shape: bf16[8,128], index: 5, kind: output, shape index: {}]  }
   0x1   :  { %s22_s19 = sshll.u32 %s1342_s18, 4  ;;  %s1318_s22 = scalar_lea.hbm %s1715_s3, 2048  ;;  %s23_s19 = int_to_ptr.vmem [resolvable:$true] %s22_s19 }
   0x2   :  { %p1319_p0 = scmp.ne.s32.totalorder %s1715_s3, %s1318_s22  ;;  %p1322_p1 = scmp.lt.u32.totalorder %s1318_s22, %s1715_s3 }
   0x4   :  { %p1324_p2 = pnand %p1322_p1, %p1319_p0 }
   0x6   :  { %1327 = shalt.err (!%p1324_p2)
}
   0x7   :  { %s1328_s27 = scalar_lea.vmem %s23_s19, 2048  ;;  %p1333_p4 = scmp.lt.s32.totalorder %s23_s19, %s23_s19 }
   0x8   :  { %p1329_p3 = scmp.ne.s32.totalorder %s23_s19, %s1328_s27  ;;  %p1334_p5 = scmp.lt.s32.totalorder %s1328_s27, %s1328_s27 }
   0xa   :  { %p1335_p6 = por %p1334_p5, %p1333_p4 }
   0xc   :  { %p1336_p7 = pnand %p1335_p6, %p1329_p3 }
   0xe   :  { %1339 = shalt.err (!%p1336_p7)
}
   0xf   :  { %s1343_s28 = smov 64   ;;  %s1344_s29 = smov 4  }
  0x10   :  { %28 = dma.hbm_to_vmem [thread:$0]  %s1715_s3, 2048, %s23_s19, [#allocation3], %s1343_s28, %s1343_s28, %s1344_s29  }
  0x11   :  { %1340 = dma.done.wait [#allocation3], 2048  }
  0x12   :  { %1341 = vsyncadd [#allocation3], 4294965248  ;;  %v1155_v0 = vld [vmem:[%s1713_s1 + $0x104] ss:$8 sps:$4 sm:$0xff]   ;;  %v1157_v1 = vld [vmem:[%s1713_s1 + $0x100] ss:$8 sps:$4 sm:$0xff]  }
  0x13   :  { %694 = vmatprep.subr.bf16.mxu0 %v1155_v0  ;;  %v1158_v2 = vld [vmem:[%s1713_s1 + $0x114] ss:$8 sps:$4 sm:$0xff]   ;;  %v1160_v3 = vld [vmem:[%s1713_s1 + $0x110] ss:$8 sps:$4 sm:$0xff]   ;;  %v1161_v4 = vld [vmem:[%s1713_s1 + $0x124] ss:$8 sps:$4 sm:$0xff]  }
  0x14   :  { %695 = vmatpush1.bf16.msra.mxu0 %v1157_v1  ;;  %v1163_v5 = vld [vmem:[%s1713_s1 + $0x120] ss:$8 sps:$4 sm:$0xff]   ;;  %v1164_v6 = vld [vmem:[%s1713_s1 + $0x134] ss:$8 sps:$4 sm:$0xff]   ;;  %v1166_v7 = vld [vmem:[%s1713_s1 + $0x130] ss:$8 sps:$4 sm:$0xff]  }
  0x15   :  { %696 = vmatprep.subr.bf16.mxu0 %v1158_v2  ;;  %v1167_v8 = vld [vmem:[%s1713_s1 + $0x144] ss:$8 sps:$4 sm:$0xff]   ;;  %v1169_v9 = vld [vmem:[%s1713_s1 + $0x140] ss:$8 sps:$4 sm:$0xff]   ;;  %v1170_v10 = vld [vmem:[%s1713_s1 + $0x154] ss:$8 sps:$4 sm:$0xff]  }
  0x16   :  { %v1172_v11 = vld [vmem:[%s1713_s1 + $0x150] ss:$8 sps:$4 sm:$0xff]   ;;  %v1197_v12 = vld [vmem:[%s1713_s1 + $0x4] ss:$8 sps:$4 sm:$0xff]   ;;  %v1199_v13 = vld [vmem:[%s1713_s1] ss:$8 sps:$4 sm:$0xff]  }
  0x17   :  { %v1173_v14 = vld [vmem:[%s1713_s1 + $0x164] ss:$8 sps:$4 sm:$0xff]   ;;  %653 = vmatprep.subr.bf16.mxu1 %v1197_v12  ;;  %v1203_v15 = vld [vmem:[%s1713_s1 + $0x14] ss:$8 sps:$4 sm:$0xff]   ;;  %v1205_v16 = vld [vmem:[%s1713_s1 + $0x10] ss:$8 sps:$4 sm:$0xff]  }
  0x18   :  { %697 = vmatpush1.bf16.msra.mxu0 %v1160_v3  ;;  %654 = vmatpush1.bf16.msra.mxu1 %v1199_v13  ;;  %v1175_v17 = vld [vmem:[%s1713_s1 + $0x160] ss:$8 sps:$4 sm:$0xff]   ;;  %v1176_v18 = vld [vmem:[%s1713_s1 + $0x174] ss:$8 sps:$4 sm:$0xff]   ;;  %v1209_v19 = vld [vmem:[%s1713_s1 + $0x24] ss:$8 sps:$4 sm:$0xff]  }
  0x19   :  { %698 = vmatprep.subr.bf16.mxu0 %v1161_v4  ;;  %655 = vmatprep.subr.bf16.mxu1 %v1203_v15  ;;  %v38_v20 = vld [vmem:[%s1712_s0 + $0x18] sm:$0xff]  ;;  %v1211_v21 = vld [vmem:[%s1713_s1 + $0x20] ss:$8 sps:$4 sm:$0xff]   ;;  %v1179_v24 = vld [vmem:[%s1713_s1 + $0x184] ss:$8 sps:$4 sm:$0xff]   ;;  %vm649_vm0 = vcmask 130048  }
  0x1a   :  { %v45_v22 = vpack.c.bf16 %v38_v20, %v38_v20  ;;  %v1178_v23 = vld [vmem:[%s1713_s1 + $0x170] ss:$8 sps:$4 sm:$0xff]   ;;  %v1215_v25 = vld [vmem:[%s1713_s1 + $0x34] ss:$8 sps:$4 sm:$0xff]   ;;  %v1181_v26 = vld [vmem:[%s1713_s1 + $0x180] ss:$8 sps:$4 sm:$0xff]  }
  0x1b   :  { %v1217_v27 = vld [vmem:[%s1713_s1 + $0x30] ss:$8 sps:$4 sm:$0xff]   ;;  %v1221_v28 = vld [vmem:[%s1713_s1 + $0x44] ss:$8 sps:$4 sm:$0xff]   ;;  %v1182_v29 = vld [vmem:[%s1713_s1 + $0x194] ss:$8 sps:$4 sm:$0xff]  }
  0x1c   :  { %699 = vmatpush1.bf16.msra.mxu0 %v1163_v5  ;;  %656 = vmatpush1.bf16.msra.mxu1 %v1205_v16  ;;  %v1184_v30 = vld [vmem:[%s1713_s1 + $0x190] ss:$8 sps:$4 sm:$0xff]   ;;  %v1223_v31 = vld [vmem:[%s1713_s1 + $0x40] ss:$8 sps:$4 sm:$0xff]   ;;  %v1227_v32 = vld [vmem:[%s1713_s1 + $0x54] ss:$8 sps:$4 sm:$0xff]  }
  0x1d   :  { %700 = vmatprep.subr.bf16.mxu0 %v1164_v6  ;;  %657 = vmatprep.subr.bf16.mxu1 %v1209_v19  ;;  %v1185_v33 = vld [vmem:[%s1713_s1 + $0x1a4] ss:$8 sps:$4 sm:$0xff]   ;;  %v1187_v34 = vld [vmem:[%s1713_s1 + $0x1a0] ss:$8 sps:$4 sm:$0xff]   ;;  %v1229_v35 = vld [vmem:[%s1713_s1 + $0x50] ss:$8 sps:$4 sm:$0xff]  }
  0x1e   :  { %726 = vmatprep.mubr.bf16.mxu0 %v45_v22  ;;  %v1233_v36 = vld [vmem:[%s1713_s1 + $0x64] ss:$8 sps:$4 sm:$0xff]   ;;  %v1188_v37 = vld [vmem:[%s1713_s1 + $0x1b4] ss:$8 sps:$4 sm:$0xff]   ;;  %v1190_v38 = vld [vmem:[%s1713_s1 + $0x1b0] ss:$8 sps:$4 sm:$0xff]  }
  0x1f   :  { %v1235_v39 = vld [vmem:[%s1713_s1 + $0x60] ss:$8 sps:$4 sm:$0xff]   ;;  %v1239_v40 = vld [vmem:[%s1713_s1 + $0x74] ss:$8 sps:$4 sm:$0xff]   ;;  %v1191_v41 = vld [vmem:[%s1713_s1 + $0x1c4] ss:$8 sps:$4 sm:$0xff]  }
  0x20   :  { %701 = vmatpush1.bf16.msra.mxu0 %v1166_v7  ;;  %658 = vmatpush1.bf16.msra.mxu1 %v1211_v21  ;;  %v1193_v42 = vld [vmem:[%s1713_s1 + $0x1c0] ss:$8 sps:$4 sm:$0xff]   ;;  %v1241_v43 = vld [vmem:[%s1713_s1 + $0x70] ss:$8 sps:$4 sm:$0xff]   ;;  %v1245_v44 = vld [vmem:[%s1713_s1 + $0x84] ss:$8 sps:$4 sm:$0xff]  }
  0x21   :  { %702 = vmatprep.subr.bf16.mxu0 %v1167_v8  ;;  %659 = vmatprep.subr.bf16.mxu1 %v1215_v25  ;;  %v1194_v45 = vld [vmem:[%s1713_s1 + $0x1d4] ss:$8 sps:$4 sm:$0xff]   ;;  %v1196_v46 = vld [vmem:[%s1713_s1 + $0x1d0] ss:$8 sps:$4 sm:$0xff]   ;;  %v1247_v47 = vld [vmem:[%s1713_s1 + $0x80] ss:$8 sps:$4 sm:$0xff]  }
  0x22   :  { %v1251_v48 = vld [vmem:[%s1713_s1 + $0x94] ss:$8 sps:$4 sm:$0xff]   ;;  %v1200_v49 = vld [vmem:[%s1713_s1 + $0x1e4] ss:$8 sps:$4 sm:$0xff]   ;;  %v1202_v50 = vld [vmem:[%s1713_s1 + $0x1e0] ss:$8 sps:$4 sm:$0xff]  }
  0x23   :  { %v1253_v51 = vld [vmem:[%s1713_s1 + $0x90] ss:$8 sps:$4 sm:$0xff]   ;;  %v1257_v52 = vld [vmem:[%s1713_s1 + $0xa4] ss:$8 sps:$4 sm:$0xff]   ;;  %v1206_v53 = vld [vmem:[%s1713_s1 + $0x1f4] ss:$8 sps:$4 sm:$0xff]  }
  0x24   :  { %703 = vmatpush1.bf16.msra.mxu0 %v1169_v9  ;;  %660 = vmatpush1.bf16.msra.mxu1 %v1217_v27  ;;  %v1208_v54 = vld [vmem:[%s1713_s1 + $0x1f0] ss:$8 sps:$4 sm:$0xff]   ;;  %v1259_v56 = vld [vmem:[%s1713_s1 + $0xa0] ss:$8 sps:$4 sm:$0xff]   ;;  %v1263_v57 = vld [vmem:[%s1713_s1 + $0xb4] ss:$8 sps:$4 sm:$0xff]  }
  0x25   :  { %704 = vmatprep.subr.bf16.mxu0 %v1170_v10  ;;  %661 = vmatprep.subr.bf16.mxu1 %v1221_v28  ;;  %v37_v55 = vld [vmem:[%s1712_s0 + $0x10] sm:$0xff]  ;;  %v1214_v58 = vld [vmem:[%s1713_s1 + $0x204] ss:$8 sps:$4 sm:$0xff]   ;;  %v1212_v62 = vld [vmem:[%s1713_s1 + $0x200] ss:$8 sps:$4 sm:$0xff]  }
  0x26   :  { %v44_v59 = vpack.c.bf16 %v37_v55, %v37_v55  ;;  %v1265_v60 = vld [vmem:[%s1713_s1 + $0xb0] ss:$8 sps:$4 sm:$0xff]   ;;  %v36_v61 = vld [vmem:[%s1712_s0 + $0x8] sm:$0xff]  ;;  %v1220_v1 = vld [vmem:[%s1713_s1 + $0x214] ss:$8 sps:$4 sm:$0xff]  }
  0x27   :  { %v1269_v63 = vld [vmem:[%s1713_s1 + $0xc4] ss:$8 sps:$4 sm:$0xff]   ;;  %v43_v0 = vpack.c.bf16 %v36_v61, %v36_v61  ;;  %v1271_v2 = vld [vmem:[%s1713_s1 + $0xc0] ss:$8 sps:$4 sm:$0xff]   ;;  %v1218_v4 = vld [vmem:[%s1713_s1 + $0x210] ss:$8 sps:$4 sm:$0xff]  }
  0x28   :  { %705 = vmatpush1.bf16.msra.mxu0 %v1172_v11  ;;  %662 = vmatpush1.bf16.msra.mxu1 %v1223_v31  ;;  %v40_v3 = vld [vmem:[%s1712_s0 + $0x28] sm:$0xff]  ;;  %v1275_v5 = vld [vmem:[%s1713_s1 + $0xd4] ss:$8 sps:$4 sm:$0xff]   ;;  %v1277_v9 = vld [vmem:[%s1713_s1 + $0xd0] ss:$8 sps:$4 sm:$0xff]  }
  0x29   :  { %706 = vmatprep.subr.bf16.mxu0 %v1173_v14  ;;  %663 = vmatprep.subr.bf16.mxu1 %v1227_v32  ;;  %v47_v6 = vpack.c.bf16 %v40_v3, %v40_v3  ;;  %v1226_v7 = vld [vmem:[%s1713_s1 + $0x224] ss:$8 sps:$4 sm:$0xff]   ;;  %v1224_v8 = vld [vmem:[%s1713_s1 + $0x220] ss:$8 sps:$4 sm:$0xff]   ;;  %v1232_v11 = vld [vmem:[%s1713_s1 + $0x234] ss:$8 sps:$4 sm:$0xff]  }
  0x2a   :  { %685 = vmatprep.mubr.bf16.mxu1 %v43_v0  ;;  %v1281_v10 = vld [vmem:[%s1713_s1 + $0xe4] ss:$8 sps:$4 sm:$0xff]   ;;  %v1230_v12 = vld [vmem:[%s1713_s1 + $0x230] ss:$8 sps:$4 sm:$0xff]   ;;  %v1283_v13 = vld [vmem:[%s1713_s1 + $0xe0] ss:$8 sps:$4 sm:$0xff]  }
  0x2b   :  { %v1287_v14 = vld [vmem:[%s1713_s1 + $0xf4] ss:$8 sps:$4 sm:$0xff]   ;;  %v1238_v15 = vld [vmem:[%s1713_s1 + $0x244] ss:$8 sps:$4 sm:$0xff]   ;;  %v1289_v16 = vld [vmem:[%s1713_s1 + $0xf0] ss:$8 sps:$4 sm:$0xff]  }
  0x2c   :  { %707 = vmatpush1.bf16.msra.mxu0 %v1175_v17  ;;  %664 = vmatpush1.bf16.msra.mxu1 %v1229_v35  ;;  %v35_v17 = vld [vmem:[%s1712_s0] sm:$0xff]  ;;  %v1244_v20 = vld [vmem:[%s1713_s1 + $0x254] ss:$8 sps:$4 sm:$0xff]   ;;  %v1254_v32 = vld [vmem:[%s1713_s1 + $0x270] ss:$8 sps:$4 sm:$0xff]  }
  0x2d   :  { %708 = vmatprep.subr.bf16.mxu0 %v1176_v18  ;;  %665 = vmatprep.subr.bf16.mxu1 %v1233_v36  ;;  %v1236_v18 = vld [vmem:[%s1713_s1 + $0x240] ss:$8 sps:$4 sm:$0xff]   ;;  %v1298_v19 = vld [vmem:[%s1713_s1 + $0x304] ss:$8 sps:$4 sm:$0xff]   ;;  %v42_v21 = vpack.c.bf16 %v35_v17, %v35_v17  ;;  %v41_v27 = vld [vmem:[%s1712_s0 + $0x30] sm:$0xff] }
  0x2e   :  { %v1296_v22 = vld [vmem:[%s1713_s1 + $0x300] ss:$8 sps:$4 sm:$0xff]   ;;  %v1250_v25 = vld [vmem:[%s1713_s1 + $0x264] ss:$8 sps:$4 sm:$0xff]   ;;  %v1303_v31 = vld [vmem:[#allocation2] sm:$0xff]  }
  0x2f   :  { %v1248_v28 = vld [vmem:[%s1713_s1 + $0x260] ss:$8 sps:$4 sm:$0xff]   ;;  %v1305_v35 = vld [vmem:[#allocation2 + $0x8] sm:$0xff]  }
  0x30   :  { %709 = vmatpush1.bf16.msra.mxu0 %v1178_v23  ;;  %666 = vmatpush1.bf16.msra.mxu1 %v1235_v39  ;;  %v1242_v23 = vld [vmem:[%s1713_s1 + $0x250] ss:$8 sps:$4 sm:$0xff]   ;;  %v1260_v36 = vld [vmem:[%s1713_s1 + $0x280] ss:$8 sps:$4 sm:$0xff]  }
  0x31   :  { %710 = vmatprep.subr.bf16.mxu0 %v1179_v24  ;;  %667 = vmatprep.subr.bf16.mxu1 %v1239_v40  ;;  %v1302_v24 = vld [vmem:[#allocation2 + $0x40] sm:$0xff]   ;;  %v1307_v39 = vld [vmem:[#allocation2 + $0x10] sm:$0xff]   ;;  %v1308_v55 = vld [vmem:[#allocation2 + $0x58] sm:$0xff]  }
  0x32   :  { %v1266_v40 = vld [vmem:[%s1713_s1 + $0x290] ss:$8 sps:$4 sm:$0xff]   ;;  %v1314_v61 = vld [vmem:[#allocation2 + $0x70] sm:$0xff]   ;;  %v1317_v0 = vld [vmem:[#allocation2 + $0x38] sm:$0xff]  }
  0x34   :  { %711 = vmatpush1.bf16.msra.mxu0 %v1181_v26  ;;  %668 = vmatpush1.bf16.msra.mxu1 %v1241_v43  ;;  %v1345_v26 = vmov 0   ;;  %v1280_v43 = vld [vmem:[%s1713_s1 + $0x2b4] ss:$8 sps:$4 sm:$0xff]  }
  0x35   :  { %712 = vmatprep.subr.bf16.mxu0 %v1182_v29  ;;  %669 = vmatprep.subr.bf16.mxu1 %v1245_v44  ;;  %v1256_v29 = vld [vmem:[%s1713_s1 + $0x274] ss:$8 sps:$4 sm:$0xff]   ;;  %v1278_v44 = vld [vmem:[%s1713_s1 + $0x2b0] ss:$8 sps:$4 sm:$0xff]  }
  0x38   :  { %713 = vmatpush1.bf16.msra.mxu0 %v1184_v30  ;;  %670 = vmatpush1.bf16.msra.mxu1 %v1247_v47  ;;  %v48_v30 = vpack.c.bf16 %v41_v27, %v41_v27  ;;  %v1292_v47 = vld [vmem:[%s1713_s1 + $0x2d4] ss:$8 sps:$4 sm:$0xff]  }
  0x39   :  { %714 = vmatprep.subr.bf16.mxu0 %v1185_v33  ;;  %671 = vmatprep.subr.bf16.mxu1 %v1251_v48  ;;  %v1304_v33 = vld [vmem:[#allocation2 + $0x48] sm:$0xff]  }
  0x3a   :  { %v1290_v48 = vld [vmem:[%s1713_s1 + $0x2d0] ss:$8 sps:$4 sm:$0xff]  }
  0x3c   :  { %715 = vmatpush1.bf16.msra.mxu0 %v1187_v34  ;;  %672 = vmatpush1.bf16.msra.mxu1 %v1253_v51  ;;  %v1262_v34 = vld [vmem:[%s1713_s1 + $0x284] ss:$8 sps:$4 sm:$0xff]   ;;  %v1301_v51 = vld [vmem:[%s1713_s1 + $0x2f4] ss:$8 sps:$4 sm:$0xff]  }
  0x3d   :  { %716 = vmatprep.subr.bf16.mxu0 %v1188_v37  ;;  %673 = vmatprep.subr.bf16.mxu1 %v1257_v52  ;;  %v1306_v37 = vld [vmem:[#allocation2 + $0x50] sm:$0xff]   ;;  %v1299_v52 = vld [vmem:[%s1713_s1 + $0x2f0] ss:$8 sps:$4 sm:$0xff]  }
  0x40   :  { %717 = vmatpush1.bf16.msra.mxu0 %v1190_v38  ;;  %674 = vmatpush1.bf16.msra.mxu1 %v1259_v56  ;;  %v1268_v38 = vld [vmem:[%s1713_s1 + $0x294] ss:$8 sps:$4 sm:$0xff]   ;;  %v1309_v56 = vld [vmem:[#allocation2 + $0x18] sm:$0xff]  }
  0x41   :  { %718 = vmatprep.subr.bf16.mxu0 %v1191_v41  ;;  %675 = vmatprep.subr.bf16.mxu1 %v1263_v57  ;;  %v1274_v41 = vld [vmem:[%s1713_s1 + $0x2a4] ss:$8 sps:$4 sm:$0xff]   ;;  %v1310_v57 = vld [vmem:[#allocation2 + $0x60] sm:$0xff]  }
  0x44   :  { %719 = vmatpush1.bf16.msra.mxu0 %v1193_v42  ;;  %676 = vmatpush1.bf16.msra.mxu1 %v1265_v60  ;;  %v1272_v42 = vld [vmem:[%s1713_s1 + $0x2a0] ss:$8 sps:$4 sm:$0xff]   ;;  %v1313_v60 = vld [vmem:[#allocation2 + $0x28] sm:$0xff]  }
  0x45   :  { %720 = vmatprep.subr.bf16.mxu0 %v1194_v45  ;;  %677 = vmatprep.subr.bf16.mxu1 %v1269_v63  ;;  %v1286_v45 = vld [vmem:[%s1713_s1 + $0x2c4] ss:$8 sps:$4 sm:$0xff]  }
  0x46   :  { %v1316_v63 = vld [vmem:[#allocation2 + $0x78] sm:$0xff]  }
  0x48   :  { %721 = vmatpush1.bf16.msra.mxu0 %v1196_v46  ;;  %678 = vmatpush1.bf16.msra.mxu1 %v1271_v2  ;;  %v1284_v46 = vld [vmem:[%s1713_s1 + $0x2c0] ss:$8 sps:$4 sm:$0xff]  }
  0x49   :  { %722 = vmatprep.subr.bf16.mxu0 %v1200_v49  ;;  %679 = vmatprep.subr.bf16.mxu1 %v1275_v5  ;;  %v1295_v49 = vld [vmem:[%s1713_s1 + $0x2e4] ss:$8 sps:$4 sm:$0xff]  }
  0x4c   :  { %723 = vmatpush1.bf16.msra.mxu0 %v1202_v50  ;;  %680 = vmatpush1.bf16.msra.mxu1 %v1277_v9  ;;  %v1293_v50 = vld [vmem:[%s1713_s1 + $0x2e0] ss:$8 sps:$4 sm:$0xff]   ;;  %v149_v9 = vlaneseq }
  0x4d   :  { %724 = vmatprep.subr.bf16.mxu0 %v1206_v53  ;;  %681 = vmatprep.subr.bf16.mxu1 %v1281_v10  ;;  %v39_v53 = vld [vmem:[%s1712_s0 + $0x20] sm:$0xff] }
  0x4e   :  { %v150_v10 = vshrl.u32 %v149_v9, 7 }
  0x50   :  { %725 = vmatpush1.bf16.msra.mxu0 %v1208_v54  ;;  %682 = vmatpush1.bf16.msra.mxu1 %v1283_v13  ;;  %v46_v54 = vpack.c.bf16 %v39_v53, %v39_v53  ;;  %v155_v13 = vsub.s32 1, %v150_v10 }
  0x51   :  { %735 = vmatprep.subr.bf16.mxu0 %v1214_v58  ;;  %683 = vmatprep.subr.bf16.mxu1 %v1287_v14  ;;  %v1311_v58 = vld [vmem:[#allocation2 + $0x20] sm:$0xff]  }
  0x53   :  { %727 = vmatmul.mubr.bf16.vlgmr.msra.gmra.mrb[0].mxu0 %v44_v59  ;;  %v1312_v59 = vld [vmem:[#allocation2 + $0x68] sm:$0xff]  }
  0x54   :  { %736 = vmatpush1.bf16.msra.mxu0 %v1212_v62  ;;  %767 = vmatprep.mubr.bf16.mxu0 %v47_v6  ;;  %v1315_v62 = vld [vmem:[#allocation2 + $0x30] sm:$0xff]  }
  0x55   :  { %737 = vmatprep.subr.bf16.mxu0 %v1220_v1  ;;  %684 = vmatpush1.bf16.msra.mxu1 %v1289_v16 }
  0x56   :  { %776 = vmatprep.subr.bf16.mxu1 %v1298_v19 }
  0x58   :  { %738 = vmatpush1.bf16.msra.mxu0 %v1218_v4  ;;  %686 = vmatmul.mubr.bf16.vlgmr.msra.gmra.mrb[0].mxu1 %v42_v21 }
  0x59   :  { %739 = vmatprep.subr.bf16.mxu0 %v1226_v7  ;;  %777 = vmatpush1.bf16.msra.mxu1 %v1296_v22 }
  0x5a   :  { %808 = vmatprep.mubr.bf16.mxu1 %v1345_v26  ;;  %1119 = vmatprep.subr.bf16.mxu1 %v1302_v24 }
  0x5c   :  { %740 = vmatpush1.bf16.msra.mxu0 %v1224_v8 }
  0x5d   :  { %741 = vmatprep.subr.bf16.mxu0 %v1232_v11  ;;  %v151_v11 = vsub.s32 0, %v150_v10 }
  0x60   :  { %742 = vmatpush1.bf16.msra.mxu0 %v1230_v12  ;;  %1101 = vmatmul.mubr.msk.bf16.vlgmr.msra.gmra.mrb[4].mxu1 %vm649_vm0, %v48_v30  ;;  %v147_v12 = vld [vmem:[%s1714_s2] sm:$0x3] }
  0x61   :  { %743 = vmatprep.subr.bf16.mxu0 %v1238_v15  ;;  %1120 = vmatpush3.bf16.msra.mxu1 %v1303_v31  ;;  %v152_v14 = vrot.slane %v147_v12, %v151_v11  ;;  %v156_v15 = vrot.slane %v147_v12, %v155_v13  ;;  %v1102_v31 = vld [vmem:[%s1716_s4] ss:$0 sm:$0xff] }
  0x62   :  { %1121 = vmatprep.subr.bf16.mxu1 %v1304_v33 }
  0x64   :  { %744 = vmatpush1.bf16.msra.mxu0 %v1236_v18 }
  0x65   :  { %745 = vmatprep.subr.bf16.mxu0 %v1244_v20  ;;  %1122 = vmatpush3.bf16.msra.mxu1 %v1305_v35 }
  0x66   :  { %1123 = vmatprep.subr.bf16.mxu1 %v1306_v37 }
  0x68   :  { %746 = vmatpush1.bf16.msra.mxu0 %v1242_v23 }
  0x69   :  { %747 = vmatprep.subr.bf16.mxu0 %v1250_v25  ;;  %1124 = vmatpush3.bf16.msra.mxu1 %v1307_v39 }
  0x6a   :  { %1125 = vmatprep.subr.bf16.mxu1 %v1308_v55 }
  0x6c   :  { %748 = vmatpush1.bf16.msra.mxu0 %v1248_v28 }
  0x6d   :  { %749 = vmatprep.subr.bf16.mxu0 %v1256_v29  ;;  %1126 = vmatpush3.bf16.msra.mxu1 %v1309_v56 }
  0x6e   :  { %1127 = vmatprep.subr.bf16.mxu1 %v1310_v57 }
  0x70   :  { %750 = vmatpush1.bf16.msra.mxu0 %v1254_v32 }
  0x71   :  { %751 = vmatprep.subr.bf16.mxu0 %v1262_v34  ;;  %1128 = vmatpush3.bf16.msra.mxu1 %v1311_v58 }
  0x72   :  { %1129 = vmatprep.subr.bf16.mxu1 %v1312_v59 }
  0x74   :  { %752 = vmatpush1.bf16.msra.mxu0 %v1260_v36 }
  0x75   :  { %753 = vmatprep.subr.bf16.mxu0 %v1268_v38  ;;  %1130 = vmatpush3.bf16.msra.mxu1 %v1313_v60 }
  0x76   :  { %1131 = vmatprep.subr.bf16.mxu1 %v1314_v61 }
  0x78   :  { %754 = vmatpush1.bf16.msra.mxu0 %v1266_v40 }
  0x79   :  { %755 = vmatprep.subr.bf16.mxu0 %v1274_v41  ;;  %1132 = vmatpush3.bf16.msra.mxu1 %v1315_v62 }
  0x7a   :  { %1133 = vmatprep.subr.bf16.mxu1 %v1316_v63 }
  0x7c   :  { %756 = vmatpush1.bf16.msra.mxu0 %v1272_v42 }
  0x7d   :  { %757 = vmatprep.subr.bf16.mxu0 %v1280_v43  ;;  %1134 = vmatpush3.bf16.msra.mxu1 %v1317_v0 }
  0x80   :  { %758 = vmatpush1.bf16.msra.mxu0 %v1278_v44 }
  0x81   :  { %759 = vmatprep.subr.bf16.mxu0 %v1286_v45 }
  0x84   :  { %760 = vmatpush1.bf16.msra.mxu0 %v1284_v46 }
  0x85   :  { %761 = vmatprep.subr.bf16.mxu0 %v1292_v47 }
  0x88   :  { %762 = vmatpush1.bf16.msra.mxu0 %v1290_v48 }
  0x89   :  { %763 = vmatprep.subr.bf16.mxu0 %v1295_v49 }
  0x8c   :  { %764 = vmatpush1.bf16.msra.mxu0 %v1293_v50 }
  0x8d   :  { %765 = vmatprep.subr.bf16.mxu0 %v1301_v51 }
  0x90   :  { %766 = vmatpush1.bf16.msra.mxu0 %v1299_v52 }
  0x93   :  { %768 = vmatmul.mubr.bf16.vlgmr.msra.gmra.mrb[0].mxu0 %v46_v54 }
 0x12b   :  { %v687_v1 = vpop.f32.mrb[0].mxu1 }
 0x12c   :  { %v689_v2 = vpop.f32.mrb[1].mxu1  ;;  %v688_v16 = vadd.f32 %v687_v1, %v152_v14 }
 0x12d   :  { %v691_v3 = vpop.f32.mrb[2].mxu1  ;;  %v690_v17 = vadd.f32 %v689_v2, %v156_v15 }
 0x12e   :  { %v692_v4 = vpop.f32.mrb[3].mxu1 }
 0x133   :  { %v810_v5 = vpop.f32.mrb[4].mxu1 }
 0x134   :  { %v812_v6 = vpop.f32.mrb[5].mxu1 }
 0x135   :  { %v814_v7 = vpop.f32.mrb[6].mxu1 }
 0x136   :  { %v815_v8 = vpop.f32.mrb[7].mxu1 }
 0x166   :  { %v769_v18 = vpop.f32.mrb[0].mxu0 }
 0x167   :  { %v1142_v19 = vadd.f32 %v769_v18, %v688_v16  ;;  %v771_v20 = vpop.f32.mrb[1].mxu0 }
 0x168   :  { %v1145_v21 = vadd.f32 %v771_v20, %v690_v17  ;;  %v773_v22 = vpop.f32.mrb[2].mxu0 }
 0x169   :  { %v1143_v23 = vadd.f32 %v1142_v19, %v810_v5  ;;  %v774_v24 = vpop.f32.mrb[3].mxu0 }
 0x16a   :  { %v1146_v25 = vadd.f32 %v1145_v21, %v812_v6 }
 0x16b   :  { %v817_v26 = vmax.f32 %v1143_v23, 0.0 }
 0x16c   :  { %v818_v27 = vmax.f32 %v1146_v25, 0.0 }
 0x16d   :  { %v819_v29 = vpack.c.bf16 %v817_v26, %v817_v26 }
 0x16e   :  { %v820_v28 = vpack.c.bf16 %v818_v27, %v818_v27 }
 0x170   :  { %988 = vmatprep.mubr.bf16.mxu1 %v820_v28 }
 0x171   :  { %989 = vmatmul.mubr.bf16.vlgmr.msra.gmra.mrb[8].mxu1 %v819_v29 }
 0x244   :  { %v1135_v30 = vpop.f32.mrb[8].mxu1 }
 0x245   :  { %v1136_v32 = vpop.f32.mrb[9].mxu1 }
 0x246   :  { %v1137_v33 = vadd.f32 %v1136_v32, %v1135_v30  ;;  %v1138_v34 = vpop.f32.mrb[10].mxu1 }
 0x247   :  { %v1139_v35 = vpop.f32.mrb[11].mxu1 }
 0x248   :  { %v991_v36 = vadd.f32 %v1137_v33, %v1102_v31 }
 0x24a   :  { %v996_v37 = vpack.c.bf16 %v991_v36, %v991_v36 }
 0x24c   :  { %997 = vst [vmem:[%s1717_s5] sm:$0xf] %v996_v37 }
 0x24d   :  { %1002 = vsyncpa [#allocation3], 1 }

</bundles_post_ra>
